<compile_context>
chip_gen: v6e
topology: v6e:2x2x1
jax: 0.10.0
libtpu: 0.0.40
codegen_flags: <defaults>
</compile_context>

<pallas_src>
import math
import functools

import jax
import jax.numpy as jnp
from jax.experimental import pallas as pl
from jax.experimental.pallas import tpu as pltpu


# ----------------------------------------------------------------------------
# Buffer setup (plain JAX) — mirrors PositionalEncodings.__init__
# ----------------------------------------------------------------------------
def make_positional_encoding(seq_len: int, d_model: int) -> jnp.ndarray:
    """pe[s, 2i] = sin(s * exp(-2i*ln(10000)/d)), pe[s, 2i+1] = cos(...); (1, S, D) f32."""
    position = jnp.arange(seq_len, dtype=jnp.float32)[:, None]            # (S, 1)
    div_term = jnp.exp(
        jnp.arange(0, d_model, 2, dtype=jnp.float32) * (-math.log(10000.0) / d_model)
    )                                                                      # (D/2,)
    angles = position * div_term                                           # (S, D/2)
    pe = jnp.zeros((seq_len, d_model), dtype=jnp.float32)
    pe = pe.at[:, 0::2].set(jnp.sin(angles))
    pe = pe.at[:, 1::2].set(jnp.cos(angles))
    return pe[None, :, :]                                                  # (1, S, D)


# ----------------------------------------------------------------------------
# Stateless counter-based hash (murmur3 fmix32) — pure int32 VPU ops.
# Arithmetic-shift + mask == logical shift; int32 multiplies wrap (two's complement).
# ----------------------------------------------------------------------------
_MUR1 = -2048144789    # 0x85ebca6b
_MUR2 = -1028477387    # 0xc2b2ae35
_GOLD = -1640531527    # 0x9e3779b9


def _fmix32(x):
    x = x ^ ((x >> 16) & jnp.int32(0x0000FFFF))
    x = x * jnp.int32(_MUR1)
    x = x ^ ((x >> 13) & jnp.int32(0x0007FFFF))
    x = x * jnp.int32(_MUR2)
    x = x ^ ((x >> 16) & jnp.int32(0x0000FFFF))
    return x


# ----------------------------------------------------------------------------
# Kernel: add positional encoding (+ optional inverted dropout)
# ----------------------------------------------------------------------------
def _pe_add_dropout_kernel(seed_ref, x_ref, pe_ref, o_ref, *,
                           n_cols: int, drop_thresh31: int,
                           keep_scale: float, use_dropout: bool):
    # x_ref : (tb, tc) rows of the flattened / folded input
    # pe_ref: (fold, tc) positional-encoding slab (fold rows per batch element)
    pe_blk = pe_ref[...].astype(jnp.float32)
    if pe_ref.shape[0] not in (1, x_ref.shape[0]):
        pe_blk = jnp.tile(pe_blk, (x_ref.shape[0] // pe_ref.shape[0], 1))
    y = x_ref[...].astype(jnp.float32) + pe_blk        # (1,tc) broadcasts if fold==1

    if use_dropout:
        tb, tc = x_ref.shape
        # Global element index in the flattened layout -> unique counter per element.
        rows = jax.lax.broadcasted_iota(jnp.int32, (tb, tc), 0) + pl.program_id(1) * tb
        cols = jax.lax.broadcasted_iota(jnp.int32, (tb, tc), 1) + pl.program_id(0) * tc
        idx = rows * jnp.int32(n_cols) + cols
        h = _fmix32(idx + seed_ref[0] * jnp.int32(_GOLD))
        r31 = h & jnp.int32(0x7FFFFFFF)                 # uniform in [0, 2^31)
        keep = r31 >= jnp.int32(drop_thresh31)          # P(drop) ~= dropout_p
        y = jnp.where(keep, y * jnp.float32(keep_scale), jnp.float32(0.0))

    o_ref[...] = y.astype(o_ref.dtype)


# ----------------------------------------------------------------------------
# Layout / tiling heuristics (padding-aware VMEM accounting)
# ----------------------------------------------------------------------------
def _choose_layout(batch: int, total: int, itemsize: int):
    LANE = 128
    target_bytes = 4 * 1024 * 1024                     # per x/out block, padded
    sub_native = 8 * max(1, 4 // max(1, itemsize))     # 8 rows f32, 16 rows bf16

    def padded_rows(tb):
        return -(-tb // sub_native) * sub_native

    # Sublane fold: present each batch row as 8 sublanes when the flattened
    # length allows it (fills vregs at tiny batch, removes pe sublane padding).
    fold = 8 if total % (8 * LANE) == 0 else 1
    rows = batch * fold
    cols = total // fold
    cols_pad = -(-cols // LANE) * LANE

    # --- rows per block ---------------------------------------------------
    if fold == 8:
        rb = 1
        while (rb * 2 <= batch and batch % (rb * 2) == 0 and rb * 8 < 256 and
               padded_rows(rb * 2 * 8) * cols_pad * itemsize <= target_bytes):
            rb *= 2
        tb = rb * 8
    else:
        if batch <= 8 or batch % 8 != 0:
            tb = batch                                  # full extent (always legal)
        else:
            tb = min(batch, 64)                         # multiple of 8

    # --- lanes per block ----------------------------------------------------
    if cols % LANE != 0:
        tc = cols                                       # full extent required
    else:
        ptb = padded_rows(tb)
        max_tc = max(LANE, (target_bytes // (ptb * itemsize)) // LANE * LANE)
        tc = min(cols, max_tc)

    # v7x: avoid a degenerate (1, 1) grid so both TensorCores get work.
    if (pl.cdiv(cols, tc) == 1 and pl.cdiv(rows, tb) == 1
            and cols % (2 * LANE) == 0 and cols >= 2 * LANE):
        tc = cols // 2

    return fold, rows, cols, tb, tc


# ----------------------------------------------------------------------------
# Wrapper
# ----------------------------------------------------------------------------
def positional_encodings_forward(x: jnp.ndarray,
                                 pe: jnp.ndarray,
                                 dropout_p: float = 0.0,
                                 seed: int = 0) -> jnp.ndarray:
    """x: (B, S, D); pe: (1, S_max, D) float32 with S_max >= S."""
    B, S, D = x.shape
    assert pe.shape[0] == 1 and pe.shape[1] >= S and pe.shape[2] == D

    total = S * D
    itemsize = jnp.dtype(x.dtype).itemsize
    fold, rows, cols, tb, tc = _choose_layout(B, total, itemsize)

    # Flatten (and possibly sublane-fold): reshapes are free (row-major views).
    x2 = x.reshape(rows, cols)
    pe2 = pe[:, :S, :].astype(jnp.float32).reshape(fold, cols)

    # Columns outer, rows inner: pe's block index depends only on the column
    # chunk, so one pe slab is reused across the whole batch axis.
    grid = (pl.cdiv(cols, tc), pl.cdiv(rows, tb))

    dropout_p = float(dropout_p)
    use_dropout = dropout_p > 0.0
    drop_thresh31 = min(int(round(dropout_p * (1 << 31))), (1 << 31) - 1)
    keep_scale = (1.0 / (1.0 - dropout_p)) if dropout_p < 1.0 else 0.0

    kernel = functools.partial(_pe_add_dropout_kernel,
                               n_cols=cols,
                               drop_thresh31=drop_thresh31,
                               keep_scale=keep_scale,
                               use_dropout=use_dropout)
    seed_arr = jnp.array([seed], dtype=jnp.int32)

    out2 = pl.pallas_call(
        kernel,
        out_shape=jax.ShapeDtypeStruct((rows, cols), x.dtype),
        grid_spec=pltpu.PrefetchScalarGridSpec(
            num_scalar_prefetch=1,                                   # seed -> SMEM
            grid=grid,
            in_specs=[
                pl.BlockSpec((tb, tc), lambda c, r, s: (r, c)),      # x tile
                pl.BlockSpec((fold, tc), lambda c, r, s: (0, c)),    # pe slab (reused)
            ],
            out_specs=pl.BlockSpec((tb, tc), lambda c, r, s: (r, c)),
        ),
        compiler_params=pltpu.CompilerParams(
            # Mask is a stateless hash of global indices -> every grid step is
            # independent; safe to shard both axes across v7x's two TensorCores.
            dimension_semantics=("parallel", "parallel"),
            vmem_limit_bytes=48 * 1024 * 1024,
        ),
    )(seed_arr, x2, pe2)

    return out2.reshape(B, S, D)


# ----------------------------------------------------------------------------
if __name__ == "__main__":
    # Small shapes consistent with the module: batch=2, seq_len=8, d_model=32.
    B, SEQ_LEN, D_MODEL = 2, 8, 32

    key = jax.random.PRNGKey(0)
    x = jax.random.normal(key, (B, SEQ_LEN, D_MODEL), dtype=jnp.float32)
    pe = make_positional_encoding(SEQ_LEN, D_MODEL)            # (1, S, D) buffer
    ref = x + pe[:, :SEQ_LEN, :]

    # 1) Eval / deterministic path (dropout = 0): exact elementwise match.
    out = jax.block_until_ready(
        positional_encodings_forward(x, pe, dropout_p=0.0, seed=0))
    assert out.shape == (B, SEQ_LEN, D_MODEL)
    assert jnp.allclose(out, ref, atol=1e-6), "mismatch vs. reference (dropout=0)"

    # 2) Training path (dropout = 0.5): every output is either 0 or ref/(1-p),
    #    and the empirical keep fraction is near 1-p.
    p = 0.5
    out_d = jax.block_until_ready(
        positional_encodings_forward(x, pe, dropout_p=p, seed=123))
    scaled = ref / (1.0 - p)
    is_dropped = jnp.abs(out_d) <= 1e-6
    is_kept = jnp.abs(out_d - scaled) <= 1e-5 * (1.0 + jnp.abs(scaled))
    assert bool(jnp.all(is_dropped | is_kept)), "dropout output not in {0, x/(1-p)}"
    keep_frac = float(jnp.mean((~is_dropped).astype(jnp.float32)))
    assert 0.2 <= keep_frac <= 0.8, f"keep fraction {keep_frac} far from 1-p"

    print("KERNEL_OK")
</pallas_src>

<mosaic_0001>
module attributes {stable_mosaic.version = 11 : i64} {
  func.func @_pe_add_dropout_kernel(%arg0: i32, %arg1: i32, %arg2: memref<1xi32, #tpu.memory_space<smem>>, %arg3: memref<2x128xf32, #tpu.memory_space<vmem>>, %arg4: memref<1x128xf32, #tpu.memory_space<vmem>>, %arg5: memref<2x128xf32, #tpu.memory_space<vmem>>) attributes {dimension_semantics = [#tpu.dimension_semantics<parallel>, #tpu.dimension_semantics<parallel>], iteration_bounds = array<i64: 2, 1>, scalar_prefetch = 1 : i64, scratch_operands = 0 : i64, tpu.core_type = #tpu.core_type<tc>, window_params = [{transform_indices = @transform_0, window_bounds = array<i64: 2, 128>}, {transform_indices = @transform_1, window_bounds = array<i64: 1, 128>}, {transform_indices = @transform_2, window_bounds = array<i64: 2, 128>}]} {
    %c0 = arith.constant 0 : index
    %c0_0 = arith.constant 0 : index
    %0 = vector.load %arg4[%c0, %c0_0] : memref<1x128xf32, #tpu.memory_space<vmem>>, vector<1x128xf32>
    %c0_1 = arith.constant 0 : index
    %c0_2 = arith.constant 0 : index
    %1 = vector.load %arg3[%c0_1, %c0_2] : memref<2x128xf32, #tpu.memory_space<vmem>>, vector<2x128xf32>
    %2 = vector.broadcast %0 : vector<1x128xf32> to vector<2x128xf32>
    %3 = arith.addf %1, %2 : vector<2x128xf32>
    %c0_3 = arith.constant 0 : index
    %c0_4 = arith.constant 0 : index
    %4 = vector.load %arg5[%c0_3, %c0_4] : memref<2x128xf32, #tpu.memory_space<vmem>>, vector<2x128xf32>
    tpu.vector_store %arg5[%c0_3, %c0_4], %3 {strides = array<i32>} : memref<2x128xf32, #tpu.memory_space<vmem>>, vector<2x128xf32>,
    return
  }
  func.func @transform_0(%arg0: i32, %arg1: i32, %arg2: memref<1xi32, #tpu.memory_space<smem>>) -> (i32, i32) {
    %c0_i32 = arith.constant 0 : i32
    return %arg1, %arg0 : i32, i32
  }
  func.func @transform_1(%arg0: i32, %arg1: i32, %arg2: memref<1xi32, #tpu.memory_space<smem>>) -> (i32, i32) {
    %c0_i32 = arith.constant 0 : i32
    %c0_i32_0 = arith.constant 0 : i32
    return %c0_i32, %arg0 : i32, i32
  }
  func.func @transform_2(%arg0: i32, %arg1: i32, %arg2: memref<1xi32, #tpu.memory_space<smem>>) -> (i32, i32) {
    %c0_i32 = arith.constant 0 : i32
    return %arg1, %arg0 : i32, i32
  }
}

</mosaic_0001>

<bundles_post_ra>
// kernel: tpu_custom_call.1
= control target key start
LH: loop header
LB: loop body
LE: loop exit
PB: predicated region body
PF: predicated region fallthrough
CT: control target
= control target key end

     0   :  { %9 = vsyncpa [#allocation5], 0  ;;  %s657_s0 = inlined_call_operand.<no memory space> [shape: s32[1], index: 0, kind: input, shape index: {}]   ;;  %s658_s1 = inlined_call_operand.hbm [shape: f32[2,256], index: 1, kind: input, shape index: {}]   ;;  %s659_s2 = inlined_call_operand.vmem [shape: f32[1,256], index: 2, kind: input, shape index: {}]   ;;  %s660_s3 = inlined_call_operand.hbm [shape: f32[2,256], index: 3, kind: output, shape index: {}]  }
   0x1   :  { %11 = vsyncpa [#allocation5 + $0x1], 0 }
   0x2   :  { %12 = vsyncpa [#allocation6], 0 }
   0x3   :  { %14 = vsyncpa [#allocation6 + $0x1], 0  ;;  %s518_s12 = smov 0   ;;  %s520_s13 = smov 0  }
   0x4   :  { %s522_s14 = smov 0   ;;  %s524_s0 = smov 0  }
   0x5   :  { %s526_s15 = smov 0   ;;  %s528_s16 = smov 0  }
   0x6 LB: > { %s310_s17 = sadd.s32 4294967295, %s494_s16   ;;  %s311_s18 = sadd.s32 4294967294, %s494_s16   ;;  %s494_s16 = sphi %s528_s16, %s20_s16   ;;  %s490_s15 = sphi %s526_s15, %s672_s15   ;;  %s486_s0 = sphi %s524_s0, %s671_s0   ;;  %s482_s14 = sphi %s522_s14, %s670_s14   ;;  %s478_s13 = sphi %s520_s13, %s669_s13   ;;  %s474_s12 = sphi %s518_s12, %s668_s12  }
   0x7   : > { %s32_s19 = sadd.s32 1, %s490_s15  ;;  %s41_s20 = sadd.s32 1, %s482_s14 }
   0x8   : > { %p34_p0 = scmp.ge.s32.totalorder %s32_s19, 2  ;;  %p48_p1 = scmp.ne.s32.totalorder %s482_s14, %s478_s13 }
   0x9   : > { %p49_p2 = scmp.eq.s32.totalorder %s494_s16, 0  ;;  %p54_p3 = scmp.ne.s32.totalorder %s478_s13, %s474_s12 }
   0xa   : > { %s674_s19 = smov (%p34_p0, %s32_s19), 0  ;;  %p55_p5 = scmp.eq.s32.totalorder %s310_s17, 0 }
   0xb   : > { %p559_p4 = por %p49_p2, %p48_p1  ;;  %s37_s22 = ssub.s32 %s490_s15, %s674_s19 }
   0xc   : > { %p106_p6 = scmp.eq.s32.totalorder %s310_s17, 1  ;;  %p39_p7 = scmp.eq.s32.totalorder %s37_s22, 0 }
   0xd   : > { %p565_p8 = por %p55_p5, %p54_p3  ;;  %p112_p10 = scmp.eq.s32.totalorder %s311_s18, 1 }
   0xe   : > { %p569_p9 = por %p106_p6, %p48_p1  ;;  %p336_p13 = scmp.lt.s32.totalorder %s494_s16, 2 }
   0xf   : > { %s574_s25 = scalar_select %p39_p7, %s482_s14, %s41_s20  }
  0x10   : > { %p576_p11 = por %p112_p10, %p54_p3  ;;  %s132_s27 = sand.u32 1, %s482_s14  }
  0x11   : > { %s314_s28 = sshll.u32 %s132_s27, 1  ;;  %s315_s29 = sshll.u32 %s490_s15, 5 }
  0x12   : > { %s664_s26 = scalar_select %p576_p11, 1, 0 }
  0x13   : > { %s143_s5 = scalar_lea.hbm %s658_s1, %s315_s29  ;;  %s136_s6 = scalar_lea.vmem [#allocation4], %s314_s28 }
  0x14   : > { %s145_s7 = sshll.u32 %s136_s6, 4  ;;  %p589_p0 = pnand %p336_p13, %p559_p4  ;;  %s146_s7 = int_to_ptr.vmem [resolvable:$true] %s145_s7 }
  0x15   : > { %p316_p1 = scmp.ge.s32.totalorder %s494_s16, 1  ;;  %p156_p2 = scmp.lt.s32.totalorder %s494_s16, 3 }
  0x16   : > { %s133_s9 = scalar_lea.sflag [#allocation5], %s132_s27  ;;  %p388_p3 = pneg %p589_p0 }
  0x17   : > { %s399_s10 = scalar_lea.vmem %s146_s7, 32  ;;  %s496_s11 = smov [#allocation4]  }
  0x18   : > { %p400_p5 = scmp.ne.s32.totalorder %s146_s7, %s399_s10  ;;  %s404_s17 = sshll.u32 %s496_s11, 4  ;;  %s405_s17 = int_to_ptr.vmem [resolvable:$false] %s404_s17 }
  0x19   : > { %s406_s18 = scalar_lea.vmem %s405_s17, 64  ;;  %p407_p10 = scmp.lt.s32.totalorder %s146_s7, %s405_s17 }
  0x1a   : > { %p402_p6 = pnand %p400_p5, %p388_p3  ;;  %p408_p12 = scmp.lt.s32.totalorder %s406_s18, %s399_s10 }
  0x1c   : > { %p403_p7 = pneg %p402_p6  ;;  %p409_p4 = por %p408_p12, %p407_p10 }
  0x1e   : > { %p410_p13 = pnand %p409_p4, %p403_p7 }
  0x20   : > { %413 = shalt.err (!%p410_p13)
}
  0x21   : > { %331 = dma.hbm_to_vmem [thread:$0]  (!%p589_p0), %s143_s5, 32, %s146_s7, %s133_s9  }
  0x22   : > { %p157_p11 = pnand %p316_p1, %p156_p2 }
  0x23   : > { %s604_s20 = sand.u32 (!%p157_p11), 1, %s478_s13  }
  0x24   : > { %160 = sbr.rel (%p157_p11) target bundleno = 68 (0x44), region = 28  ;;  %s317_s21 = sshll.u32 (!%p157_p11), %s604_s20, 1 }
  0x25   : > { %s163_s22 = scalar_lea.sflag (!%p157_p11), [#allocation5], %s604_s20  ;;  %s166_s27 = scalar_lea.vmem (!%p157_p11), [#allocation4], %s317_s21 }
  0x29   : > { %465 = dma.done.wait (%p565_p8), %s163_s22, 32  }
  0x2a   : > { %467 = vsyncadd (%p565_p8), %s163_s22, 4294967264  ;;  %p190_p11 = scmp.lt.s32.totalorder %s486_s0, 1  ;;  %s189_s5 = scalar_lea.vmem [#allocation7], %s317_s21  ;;  %v194_v1 = vld [vmem:[%s166_s27] sm:$0x3] }
  0x2b   : > { %s219_s6 = sshll.u32 %s189_s5, 4  ;;  %s321_s7 = sshll.u32 %s486_s0, 5  ;;  %s220_s6 = int_to_ptr.vmem [resolvable:$true] %s219_s6 }
  0x2c   : > { %s191_s28 = scalar_select %p190_p11, %s486_s0, 1 }
  0x2d   : > { %s217_s9 = scalar_lea.hbm %s660_s3, %s321_s7  ;;  %s204_s10 = scalar_lea.sflag [#allocation6], %s604_s20 }
  0x2e   : > { %s192_s4 = scalar_lea.vmem %s659_s2, %s191_s28  ;;  %s414_s11 = scalar_lea.vmem %s220_s6, 32 }
  0x2f   : > { %v319_v0 = vld [vmem:[%s192_s4] ss:$0 sm:$0xff]  ;;  %p415_p8 = scmp.ne.s32.totalorder %s220_s6, %s414_s11  ;;  %s497_s17 = smov [#allocation7]  }
  0x30   : > { %v201_v2 = vadd.f32 %v319_v0, %v194_v1  ;;  %s418_s18 = sshll.u32 %s497_s17, 4  ;;  %s419_s18 = int_to_ptr.vmem [resolvable:$false] %s418_s18 }
  0x31   : > { %p416_p12 = pnand %p415_p8, %p569_p9  ;;  %s420_s21 = scalar_lea.vmem %s419_s18, 64 }
  0x32   : > { %202 = vst [vmem:[%s189_s5] sm:$0x3] %v201_v2  ;;  %p421_p1 = scmp.lt.s32.totalorder %s220_s6, %s419_s18  ;;  %p422_p2 = scmp.lt.s32.totalorder %s420_s21, %s414_s11 }
  0x33   : > { %p417_p0 = pneg %p416_p12 }
  0x34   : > { %p423_p3 = por %p422_p2, %p421_p1 }
  0x36   : > { %p424_p5 = pnand %p423_p3, %p417_p0 }
  0x38   : > { %427 = shalt.err (!%p424_p5)
}
  0x39   : > { %s428_s0 = scalar_lea.hbm %s217_s9, 32  ;;  %s432_s27 = scalar_lea.hbm %s660_s3, 64 }
  0x3a   : > { %p429_p6 = scmp.ne.s32.totalorder %s217_s9, %s428_s0  ;;  %p433_p4 = scmp.lt.s32.totalorder %s217_s9, %s660_s3 }
  0x3b   : > { %p434_p13 = scmp.lt.s32.totalorder %s432_s27, %s428_s0 }
  0x3c   : > { %p430_p7 = pnand %p429_p6, %p569_p9 }
  0x3d   : > { %p435_p11 = por %p434_p13, %p433_p4 }
  0x3e   : > { %p431_p10 = pneg %p430_p7 }
  0x40   : > { %p436_p8 = pnand %p435_p11, %p431_p10 }
  0x42   : > { %439 = shalt.err (!%p436_p8)
}
  0x43   : > { %326 = dma.vmem_to_hbm [thread:$0]  (%p569_p9), %s220_s6, 32, %s217_s9, %s204_s10  }
  0x44 PF: > { %s231_s30 = sand.u32 1, %s474_s12   ;;  %p666_p12 = scmp.ne.s32.totalorder %s664_s26, 0 }
  0x45   : > { %p667_p0 = scmp.ge.s32.totalorder %s494_s16, 2  ;;  %s232_s4 = scalar_lea.sflag [#allocation6], %s231_s30 }
  0x47   : > { %p333_p1 = pnand %p667_p0, %p666_p12 }
  0x49   : > { %p334_p2 = pneg %p333_p1 }
  0x4b   : > { %469 = dma.done.wait (%p334_p2), %s232_s4, 32  }
  0x4c   : > { %471 = vsyncadd (%p334_p2), %s232_s4, 4294967264  ;;  %s20_s16 = sadd.s32 1, %s494_s16   ;;  %s668_s12 = smov %s478_s13 }
  0x4d   : > { %p17_p3 = scmp.ge.s32.totalorder %s20_s16, 4   ;;  %s669_s13 = smov %s482_s14 }
  0x4e   : > { %s670_s14 = smov %s574_s25  ;;  %s671_s0 = smov %s490_s15 }
  0x4f   : > { %s672_s15 = smov %s674_s19  ;;  %19 = sbr.rel (!%p17_p3) target bundleno = 6 (0x6), region = 76 }
  0x54   :  { %237 = vsyncpa [#allocation5], 1 }
  0x55   :  { %239 = vsyncpa [#allocation5 + $0x1], 1 }
  0x56   :  { %240 = vsyncpa [#allocation6], 1 }
  0x57   :  { %242 = vsyncpa [#allocation6 + $0x1], 1 }

</bundles_post_ra>
